<compile_context>
chip_gen: v7x
topology: tpu7x:2x2x1
jax: 0.10.0
libtpu: 0.0.40
codegen_flags: <defaults>
</compile_context>

<pallas_src>
import jax
import jax.numpy as jnp
import numpy as np
from jax.experimental import pallas as pl
from jax.experimental.pallas import tpu as pltpu


def wisard_kernel(idx_ref, table_ref, bias_ref, out_ref):
    """One grid step = one batch tile, all filters fused.

    idx_ref   : (F, H, TB)  int32    H3 hash indices for this batch tile
    table_ref : (F, E, Cp)  bfloat16 pre-signed (+/-1) per-filter tables,
                                     classes padded to Cp (pad lanes = 0)
    bias_ref  : (1, Cp)     float32  per-class bias (padded lanes are zero)
    out_ref   : (TB, Cp)    float32  class activations for this batch tile
    """
    F, H, TB = idx_ref.shape
    _, E, Cp = table_ref.shape

    idx = idx_ref[...]                                           # (F, H, TB)
    # Hoisted: one iota reused by every filter's one-hot build.
    iota_e = jax.lax.broadcasted_iota(jnp.int32, (H, TB, E), 2)

    acc = jnp.zeros((TB, Cp), jnp.float32)
    # F is small and static -> straight-line code. One MXU matmul per filter
    # with M = H*TB (all hash functions stacked), N = Cp (full 128 lanes).
    # Table entries are pre-signed +/-1, so the one-hot matmul result IS the
    # binarized lookup (exactly one nonzero term -> exact +/-1 in f32).
    for f in range(F):
        onehot = (idx[f][:, :, None] == iota_e).astype(jnp.bfloat16)   # (H,TB,E)
        sign = jnp.dot(onehot.reshape(H * TB, E), table_ref[f],
                       preferred_element_type=jnp.float32)              # (H*TB,Cp)
        # AND over the H hash functions == elementwise min over the H blocks.
        red = sign[0:TB, :]
        for h in range(1, H):
            red = jnp.minimum(red, sign[h * TB:(h + 1) * TB, :])
        acc = acc + red
    out_ref[...] = acc + bias_ref[...]


def _round_up(x, m):
    return ((x + m - 1) // m) * m


def backprop_wisard_forward(x_bits, input_order, hash_vals, table, bias):
    """Pad/shuffle bits, H3-hash in XLA, pre-sign table, call the kernel."""
    B, n_inputs = x_bits.shape
    H, I = hash_vals.shape
    C, F, E = table.shape
    assert (E & (E - 1)) == 0, "filter_entries must be a power of two"
    input_bits = F * I
    null_bits = input_bits - n_inputs

    # --- H3 hash outside the kernel (cheap XOR-reduce over I bits) ---
    padded = jnp.pad(x_bits, ((0, 0), (0, null_bits)))
    mapped = padded[:, input_order]                              # (B, F*I)
    hin = mapped.reshape(B, F, I)
    hv = hash_vals.astype(jnp.int32)
    idx = jnp.zeros((B, F, H), dtype=jnp.int32)
    for i in range(I):
        idx = jnp.bitwise_xor(
            idx, jnp.where(hin[:, :, i:i + 1] != 0, hv[None, None, :, i], 0))

    # --- restage for the kernel: batch tiling + lane-dense class dim ---
    TB = 128 if B >= 128 else _round_up(B, 8)
    B_pad = _round_up(B, TB)
    Cp = _round_up(C, 128)

    idx_fhb = jnp.pad(idx, ((0, B_pad - B), (0, 0), (0, 0))).transpose(1, 2, 0)
    # Pre-signed table: +/-1 per entry (exactly BinarizeFunction's x>=0 rule),
    # bf16 (exact for +/-1 and 0), classes padded to full lanes with zeros.
    table_sign = jnp.where(table >= 0, 1.0, -1.0).astype(jnp.bfloat16)
    table_fec = jnp.pad(table_sign.transpose(1, 2, 0),
                        ((0, 0), (0, 0), (0, Cp - C)))           # (F, E, Cp)
    bias_p = jnp.pad(bias.astype(jnp.float32), (0, Cp - C)).reshape(1, Cp)

    out = pl.pallas_call(
        wisard_kernel,
        out_shape=jax.ShapeDtypeStruct((B_pad, Cp), jnp.float32),
        grid=(B_pad // TB,),
        in_specs=[
            pl.BlockSpec((F, H, TB), lambda b: (0, 0, b)),
            pl.BlockSpec((F, E, Cp), lambda b: (0, 0, 0)),   # resident table
            pl.BlockSpec((1, Cp), lambda b: (0, 0)),          # resident bias
        ],
        out_specs=pl.BlockSpec((TB, Cp), lambda b: (b, 0)),
        compiler_params=pltpu.CompilerParams(
            dimension_semantics=("parallel",),
            vmem_limit_bytes=32 * 1024 * 1024),
    )(idx_fhb, table_fec, bias_p)
    return out[:B, :C]


def reference_forward(x_bits, input_order, hash_vals, table, bias):
    """Pure-JAX reference mirroring the PyTorch forward semantics."""
    B = x_bits.shape[0]
    H, I = hash_vals.shape
    C, F, E = table.shape
    input_bits = F * I
    null_bits = input_bits - x_bits.shape[1]

    padded = jnp.pad(x_bits, ((0, 0), (0, null_bits)))
    mapped = padded[:, input_order]
    hin = mapped.reshape(B, F, I)

    idx = jnp.zeros((B, F, H), dtype=jnp.int32)
    for i in range(I):
        idx = jnp.bitwise_xor(
            idx,
            jnp.where(hin[:, :, i:i + 1] != 0, hash_vals[None, None, :, i], 0))

    idx_b = jnp.broadcast_to(idx[:, None, :, :], (B, C, F, H))
    table_b = jnp.broadcast_to(table[None], (B, C, F, E))
    lookup = jnp.take_along_axis(table_b, idx_b, axis=3)         # (B, C, F, H)
    sign = jnp.where(lookup >= 0, 1.0, -1.0)
    reduced = sign.min(axis=-1)                                   # (B, C, F)
    return reduced.sum(axis=-1) + bias[None, :]                   # (B, C)


if __name__ == "__main__":
    key = jax.random.PRNGKey(0)
    k1, k2, k3, k4 = jax.random.split(key, 4)

    # Small, module-consistent config.
    batch = 16
    n_inputs = 62                   # -> input_bits=64, null_bits=2
    classes = 10
    filter_inputs = 8
    filter_entries = 128            # power of two (required for H3 / XOR)
    filter_hash_functions = 4

    input_bits = int(np.ceil(n_inputs / filter_inputs)) * filter_inputs
    filters_per_discriminator = input_bits // filter_inputs

    # Deterministic "parameters" (synthetic init mirroring __init__ shapes).
    x_bits = jax.random.bernoulli(k1, 0.5, (batch, n_inputs)).astype(jnp.int32)
    input_order = jax.random.permutation(k2, input_bits)
    hash_vals = jax.random.randint(
        k3, (filter_hash_functions, filter_inputs), 0, filter_entries,
        dtype=jnp.int32)
    table = jax.random.uniform(
        k4, (classes, filters_per_discriminator, filter_entries),
        minval=-1.0, maxval=1.0, dtype=jnp.float32)
    bias = jnp.zeros((classes,), jnp.float32)

    out = backprop_wisard_forward(x_bits, input_order, hash_vals, table, bias)
    out = jax.block_until_ready(out)

    ref = reference_forward(x_bits, input_order, hash_vals, table, bias)
    assert out.shape == (batch, classes)
    assert np.allclose(np.asarray(out), np.asarray(ref), atol=1e-5), (
        "Pallas kernel mismatch vs JAX reference")
    print("KERNEL_OK")
</pallas_src>

<mosaic_0001>
module attributes {stable_mosaic.version = 11 : i64} {
  func.func @wisard_kernel(%arg0: i32, %arg1: memref<8x4x16xi32, #tpu.memory_space<vmem>>, %arg2: memref<8x128x128xbf16, #tpu.memory_space<vmem>>, %arg3: memref<1x128xf32, #tpu.memory_space<vmem>>, %arg4: memref<16x128xf32, #tpu.memory_space<vmem>>) attributes {dimension_semantics = [#tpu.dimension_semantics<parallel>], iteration_bounds = array<i64: 1>, scalar_prefetch = 0 : i64, scratch_operands = 0 : i64, tpu.core_type = #tpu.core_type<tc>, window_params = [{transform_indices = @transform_0, window_bounds = array<i64: 8, 4, 16>}, {pipeline_mode = #tpu.pipeline_mode<synchronous>, transform_indices = @transform_1, window_bounds = array<i64: 8, 128, 128>}, {pipeline_mode = #tpu.pipeline_mode<synchronous>, transform_indices = @transform_2, window_bounds = array<i64: 1, 128>}, {transform_indices = @transform_3, window_bounds = array<i64: 16, 128>}]} {
    %c0 = arith.constant 0 : index
    %c0_0 = arith.constant 0 : index
    %c0_1 = arith.constant 0 : index
    %0 = vector.load %arg1[%c0, %c0_0, %c0_1] : memref<8x4x16xi32, #tpu.memory_space<vmem>>, vector<8x4x16xi32>
    %1 = tpu.iota {dimensions = array<i32: 2>} : vector<4x16x128xi32>
    %cst = arith.constant 0.000000e+00 : f32
    %2 = vector.broadcast %cst : f32 to vector<16x128xf32>
    %3 = vector.extract_strided_slice %0 {offsets = [0, 0, 0], sizes = [1, 4, 16], strides = [1, 1, 1]} : vector<8x4x16xi32> to vector<1x4x16xi32>
    %4 = vector.shape_cast %3 : vector<1x4x16xi32> to vector<4x16xi32>
    %5 = vector.shape_cast %4 : vector<4x16xi32> to vector<4x16x1xi32>
    %6 = vector.broadcast %5 : vector<4x16x1xi32> to vector<4x16x128xi32>
    %7 = arith.cmpi eq, %6, %1 : vector<4x16x128xi32>
    %8 = arith.extui %7 : vector<4x16x128xi1> to vector<4x16x128xi32>
    %9 = arith.sitofp %8 : vector<4x16x128xi32> to vector<4x16x128xf32>
    %10 = arith.truncf %9 : vector<4x16x128xf32> to vector<4x16x128xbf16>
    %11 = vector.shape_cast %10 : vector<4x16x128xbf16> to vector<64x128xbf16>
    %c0_2 = arith.constant 0 : index
    %c0_3 = arith.constant 0 : index
    %c0_4 = arith.constant 0 : index
    %12 = vector.load %arg2[%c0_2, %c0_3, %c0_4] : memref<8x128x128xbf16, #tpu.memory_space<vmem>>, vector<1x128x128xbf16>
    %13 = vector.shape_cast %12 : vector<1x128x128xbf16> to vector<128x128xbf16>
    %cst_5 = arith.constant dense<0.000000e+00> : vector<64x128xf32>
    %14 = tpu.matmul %11, %13, %cst_5 {dimension_numbers = #tpu.dot_dimension_numbers<[1], [0], [0], [1], [0, 0, 1, 1], [], []>} : vector<64x128xbf16>, vector<128x128xbf16>, vector<64x128xf32> -> vector<64x128xf32>
    %15 = vector.extract_strided_slice %14 {offsets = [0, 0], sizes = [16, 128], strides = [1, 1]} : vector<64x128xf32> to vector<16x128xf32>
    %16 = vector.extract_strided_slice %14 {offsets = [16, 0], sizes = [16, 128], strides = [1, 1]} : vector<64x128xf32> to vector<16x128xf32>
    %17 = arith.minimumf %15, %16 : vector<16x128xf32>
    %18 = vector.extract_strided_slice %14 {offsets = [32, 0], sizes = [16, 128], strides = [1, 1]} : vector<64x128xf32> to vector<16x128xf32>
    %19 = arith.minimumf %17, %18 : vector<16x128xf32>
    %20 = vector.extract_strided_slice %14 {offsets = [48, 0], sizes = [16, 128], strides = [1, 1]} : vector<64x128xf32> to vector<16x128xf32>
    %21 = arith.minimumf %19, %20 : vector<16x128xf32>
    %22 = arith.addf %2, %21 : vector<16x128xf32>
    %23 = vector.extract_strided_slice %0 {offsets = [1, 0, 0], sizes = [1, 4, 16], strides = [1, 1, 1]} : vector<8x4x16xi32> to vector<1x4x16xi32>
    %24 = vector.shape_cast %23 : vector<1x4x16xi32> to vector<4x16xi32>
    %25 = vector.shape_cast %24 : vector<4x16xi32> to vector<4x16x1xi32>
    %26 = vector.broadcast %25 : vector<4x16x1xi32> to vector<4x16x128xi32>
    %27 = arith.cmpi eq, %26, %1 : vector<4x16x128xi32>
    %28 = arith.extui %27 : vector<4x16x128xi1> to vector<4x16x128xi32>
    %29 = arith.sitofp %28 : vector<4x16x128xi32> to vector<4x16x128xf32>
    %30 = arith.truncf %29 : vector<4x16x128xf32> to vector<4x16x128xbf16>
    %31 = vector.shape_cast %30 : vector<4x16x128xbf16> to vector<64x128xbf16>
    %c1 = arith.constant 1 : index
    %c0_6 = arith.constant 0 : index
    %c0_7 = arith.constant 0 : index
    %32 = vector.load %arg2[%c1, %c0_6, %c0_7] : memref<8x128x128xbf16, #tpu.memory_space<vmem>>, vector<1x128x128xbf16>
    %33 = vector.shape_cast %32 : vector<1x128x128xbf16> to vector<128x128xbf16>
    %cst_8 = arith.constant dense<0.000000e+00> : vector<64x128xf32>
    %34 = tpu.matmul %31, %33, %cst_8 {dimension_numbers = #tpu.dot_dimension_numbers<[1], [0], [0], [1], [0, 0, 1, 1], [], []>} : vector<64x128xbf16>, vector<128x128xbf16>, vector<64x128xf32> -> vector<64x128xf32>
    %35 = vector.extract_strided_slice %34 {offsets = [0, 0], sizes = [16, 128], strides = [1, 1]} : vector<64x128xf32> to vector<16x128xf32>
    %36 = vector.extract_strided_slice %34 {offsets = [16, 0], sizes = [16, 128], strides = [1, 1]} : vector<64x128xf32> to vector<16x128xf32>
    %37 = arith.minimumf %35, %36 : vector<16x128xf32>
    %38 = vector.extract_strided_slice %34 {offsets = [32, 0], sizes = [16, 128], strides = [1, 1]} : vector<64x128xf32> to vector<16x128xf32>
    %39 = arith.minimumf %37, %38 : vector<16x128xf32>
    %40 = vector.extract_strided_slice %34 {offsets = [48, 0], sizes = [16, 128], strides = [1, 1]} : vector<64x128xf32> to vector<16x128xf32>
    %41 = arith.minimumf %39, %40 : vector<16x128xf32>
    %42 = arith.addf %22, %41 : vector<16x128xf32>
    %43 = vector.extract_strided_slice %0 {offsets = [2, 0, 0], sizes = [1, 4, 16], strides = [1, 1, 1]} : vector<8x4x16xi32> to vector<1x4x16xi32>
    %44 = vector.shape_cast %43 : vector<1x4x16xi32> to vector<4x16xi32>
    %45 = vector.shape_cast %44 : vector<4x16xi32> to vector<4x16x1xi32>
    %46 = vector.broadcast %45 : vector<4x16x1xi32> to vector<4x16x128xi32>
    %47 = arith.cmpi eq, %46, %1 : vector<4x16x128xi32>
    %48 = arith.extui %47 : vector<4x16x128xi1> to vector<4x16x128xi32>
    %49 = arith.sitofp %48 : vector<4x16x128xi32> to vector<4x16x128xf32>
    %50 = arith.truncf %49 : vector<4x16x128xf32> to vector<4x16x128xbf16>
    %51 = vector.shape_cast %50 : vector<4x16x128xbf16> to vector<64x128xbf16>
    %c2 = arith.constant 2 : index
    %c0_9 = arith.constant 0 : index
    %c0_10 = arith.constant 0 : index
    %52 = vector.load %arg2[%c2, %c0_9, %c0_10] : memref<8x128x128xbf16, #tpu.memory_space<vmem>>, vector<1x128x128xbf16>
    %53 = vector.shape_cast %52 : vector<1x128x128xbf16> to vector<128x128xbf16>
    %cst_11 = arith.constant dense<0.000000e+00> : vector<64x128xf32>
    %54 = tpu.matmul %51, %53, %cst_11 {dimension_numbers = #tpu.dot_dimension_numbers<[1], [0], [0], [1], [0, 0, 1, 1], [], []>} : vector<64x128xbf16>, vector<128x128xbf16>, vector<64x128xf32> -> vector<64x128xf32>
    %55 = vector.extract_strided_slice %54 {offsets = [0, 0], sizes = [16, 128], strides = [1, 1]} : vector<64x128xf32> to vector<16x128xf32>
    %56 = vector.extract_strided_slice %54 {offsets = [16, 0], sizes = [16, 128], strides = [1, 1]} : vector<64x128xf32> to vector<16x128xf32>
    %57 = arith.minimumf %55, %56 : vector<16x128xf32>
    %58 = vector.extract_strided_slice %54 {offsets = [32, 0], sizes = [16, 128], strides = [1, 1]} : vector<64x128xf32> to vector<16x128xf32>
    %59 = arith.minimumf %57, %58 : vector<16x128xf32>
    %60 = vector.extract_strided_slice %54 {offsets = [48, 0], sizes = [16, 128], strides = [1, 1]} : vector<64x128xf32> to vector<16x128xf32>
    %61 = arith.minimumf %59, %60 : vector<16x128xf32>
    %62 = arith.addf %42, %61 : vector<16x128xf32>
    %63 = vector.extract_strided_slice %0 {offsets = [3, 0, 0], sizes = [1, 4, 16], strides = [1, 1, 1]} : vector<8x4x16xi32> to vector<1x4x16xi32>
    %64 = vector.shape_cast %63 : vector<1x4x16xi32> to vector<4x16xi32>
    %65 = vector.shape_cast %64 : vector<4x16xi32> to vector<4x16x1xi32>
    %66 = vector.broadcast %65 : vector<4x16x1xi32> to vector<4x16x128xi32>
    %67 = arith.cmpi eq, %66, %1 : vector<4x16x128xi32>
    %68 = arith.extui %67 : vector<4x16x128xi1> to vector<4x16x128xi32>
    %69 = arith.sitofp %68 : vector<4x16x128xi32> to vector<4x16x128xf32>
    %70 = arith.truncf %69 : vector<4x16x128xf32> to vector<4x16x128xbf16>
    %71 = vector.shape_cast %70 : vector<4x16x128xbf16> to vector<64x128xbf16>
    %c3 = arith.constant 3 : index
    %c0_12 = arith.constant 0 : index
    %c0_13 = arith.constant 0 : index
    %72 = vector.load %arg2[%c3, %c0_12, %c0_13] : memref<8x128x128xbf16, #tpu.memory_space<vmem>>, vector<1x128x128xbf16>
    %73 = vector.shape_cast %72 : vector<1x128x128xbf16> to vector<128x128xbf16>
    %cst_14 = arith.constant dense<0.000000e+00> : vector<64x128xf32>
    %74 = tpu.matmul %71, %73, %cst_14 {dimension_numbers = #tpu.dot_dimension_numbers<[1], [0], [0], [1], [0, 0, 1, 1], [], []>} : vector<64x128xbf16>, vector<128x128xbf16>, vector<64x128xf32> -> vector<64x128xf32>
    %75 = vector.extract_strided_slice %74 {offsets = [0, 0], sizes = [16, 128], strides = [1, 1]} : vector<64x128xf32> to vector<16x128xf32>
    %76 = vector.extract_strided_slice %74 {offsets = [16, 0], sizes = [16, 128], strides = [1, 1]} : vector<64x128xf32> to vector<16x128xf32>
    %77 = arith.minimumf %75, %76 : vector<16x128xf32>
    %78 = vector.extract_strided_slice %74 {offsets = [32, 0], sizes = [16, 128], strides = [1, 1]} : vector<64x128xf32> to vector<16x128xf32>
    %79 = arith.minimumf %77, %78 : vector<16x128xf32>
    %80 = vector.extract_strided_slice %74 {offsets = [48, 0], sizes = [16, 128], strides = [1, 1]} : vector<64x128xf32> to vector<16x128xf32>
    %81 = arith.minimumf %79, %80 : vector<16x128xf32>
    %82 = arith.addf %62, %81 : vector<16x128xf32>
    %83 = vector.extract_strided_slice %0 {offsets = [4, 0, 0], sizes = [1, 4, 16], strides = [1, 1, 1]} : vector<8x4x16xi32> to vector<1x4x16xi32>
    %84 = vector.shape_cast %83 : vector<1x4x16xi32> to vector<4x16xi32>
    %85 = vector.shape_cast %84 : vector<4x16xi32> to vector<4x16x1xi32>
    %86 = vector.broadcast %85 : vector<4x16x1xi32> to vector<4x16x128xi32>
    %87 = arith.cmpi eq, %86, %1 : vector<4x16x128xi32>
    %88 = arith.extui %87 : vector<4x16x128xi1> to vector<4x16x128xi32>
    %89 = arith.sitofp %88 : vector<4x16x128xi32> to vector<4x16x128xf32>
    %90 = arith.truncf %89 : vector<4x16x128xf32> to vector<4x16x128xbf16>
    %91 = vector.shape_cast %90 : vector<4x16x128xbf16> to vector<64x128xbf16>
    %c4 = arith.constant 4 : index
    %c0_15 = arith.constant 0 : index
    %c0_16 = arith.constant 0 : index
    %92 = vector.load %arg2[%c4, %c0_15, %c0_16] : memref<8x128x128xbf16, #tpu.memory_space<vmem>>, vector<1x128x128xbf16>
    %93 = vector.shape_cast %92 : vector<1x128x128xbf16> to vector<128x128xbf16>
    %cst_17 = arith.constant dense<0.000000e+00> : vector<64x128xf32>
    %94 = tpu.matmul %91, %93, %cst_17 {dimension_numbers = #tpu.dot_dimension_numbers<[1], [0], [0], [1], [0, 0, 1, 1], [], []>} : vector<64x128xbf16>, vector<128x128xbf16>, vector<64x128xf32> -> vector<64x128xf32>
    %95 = vector.extract_strided_slice %94 {offsets = [0, 0], sizes = [16, 128], strides = [1, 1]} : vector<64x128xf32> to vector<16x128xf32>
    %96 = vector.extract_strided_slice %94 {offsets = [16, 0], sizes = [16, 128], strides = [1, 1]} : vector<64x128xf32> to vector<16x128xf32>
    %97 = arith.minimumf %95, %96 : vector<16x128xf32>
    %98 = vector.extract_strided_slice %94 {offsets = [32, 0], sizes = [16, 128], strides = [1, 1]} : vector<64x128xf32> to vector<16x128xf32>
    %99 = arith.minimumf %97, %98 : vector<16x128xf32>
    %100 = vector.extract_strided_slice %94 {offsets = [48, 0], sizes = [16, 128], strides = [1, 1]} : vector<64x128xf32> to vector<16x128xf32>
    %101 = arith.minimumf %99, %100 : vector<16x128xf32>
    %102 = arith.addf %82, %101 : vector<16x128xf32>
    %103 = vector.extract_strided_slice %0 {offsets = [5, 0, 0], sizes = [1, 4, 16], strides = [1, 1, 1]} : vector<8x4x16xi32> to vector<1x4x16xi32>
    %104 = vector.shape_cast %103 : vector<1x4x16xi32> to vector<4x16xi32>
    %105 = vector.shape_cast %104 : vector<4x16xi32> to vector<4x16x1xi32>
    %106 = vector.broadcast %105 : vector<4x16x1xi32> to vector<4x16x128xi32>
    %107 = arith.cmpi eq, %106, %1 : vector<4x16x128xi32>
    %108 = arith.extui %107 : vector<4x16x128xi1> to vector<4x16x128xi32>
    %109 = arith.sitofp %108 : vector<4x16x128xi32> to vector<4x16x128xf32>
    %110 = arith.truncf %109 : vector<4x16x128xf32> to vector<4x16x128xbf16>
    %111 = vector.shape_cast %110 : vector<4x16x128xbf16> to vector<64x128xbf16>
    %c5 = arith.constant 5 : index
    %c0_18 = arith.constant 0 : index
    %c0_19 = arith.constant 0 : index
    %112 = vector.load %arg2[%c5, %c0_18, %c0_19] : memref<8x128x128xbf16, #tpu.memory_space<vmem>>, vector<1x128x128xbf16>
    %113 = vector.shape_cast %112 : vector<1x128x128xbf16> to vector<128x128xbf16>
    %cst_20 = arith.constant dense<0.000000e+00> : vector<64x128xf32>
    %114 = tpu.matmul %111, %113, %cst_20 {dimension_numbers = #tpu.dot_dimension_numbers<[1], [0], [0], [1], [0, 0, 1, 1], [], []>} : vector<64x128xbf16>, vector<128x128xbf16>, vector<64x128xf32> -> vector<64x128xf32>
    %115 = vector.extract_strided_slice %114 {offsets = [0, 0], sizes = [16, 128], strides = [1, 1]} : vector<64x128xf32> to vector<16x128xf32>
    %116 = vector.extract_strided_slice %114 {offsets = [16, 0], sizes = [16, 128], strides = [1, 1]} : vector<64x128xf32> to vector<16x128xf32>
    %117 = arith.minimumf %115, %116 : vector<16x128xf32>
    %118 = vector.extract_strided_slice %114 {offsets = [32, 0], sizes = [16, 128], strides = [1, 1]} : vector<64x128xf32> to vector<16x128xf32>
    %119 = arith.minimumf %117, %118 : vector<16x128xf32>
    %120 = vector.extract_strided_slice %114 {offsets = [48, 0], sizes = [16, 128], strides = [1, 1]} : vector<64x128xf32> to vector<16x128xf32>
    %121 = arith.minimumf %119, %120 : vector<16x128xf32>
    %122 = arith.addf %102, %121 : vector<16x128xf32>
    %123 = vector.extract_strided_slice %0 {offsets = [6, 0, 0], sizes = [1, 4, 16], strides = [1, 1, 1]} : vector<8x4x16xi32> to vector<1x4x16xi32>
    %124 = vector.shape_cast %123 : vector<1x4x16xi32> to vector<4x16xi32>
    %125 = vector.shape_cast %124 : vector<4x16xi32> to vector<4x16x1xi32>
    %126 = vector.broadcast %125 : vector<4x16x1xi32> to vector<4x16x128xi32>
    %127 = arith.cmpi eq, %126, %1 : vector<4x16x128xi32>
    %128 = arith.extui %127 : vector<4x16x128xi1> to vector<4x16x128xi32>
    %129 = arith.sitofp %128 : vector<4x16x128xi32> to vector<4x16x128xf32>
    %130 = arith.truncf %129 : vector<4x16x128xf32> to vector<4x16x128xbf16>
    %131 = vector.shape_cast %130 : vector<4x16x128xbf16> to vector<64x128xbf16>
    %c6 = arith.constant 6 : index
    %c0_21 = arith.constant 0 : index
    %c0_22 = arith.constant 0 : index
    %132 = vector.load %arg2[%c6, %c0_21, %c0_22] : memref<8x128x128xbf16, #tpu.memory_space<vmem>>, vector<1x128x128xbf16>
    %133 = vector.shape_cast %132 : vector<1x128x128xbf16> to vector<128x128xbf16>
    %cst_23 = arith.constant dense<0.000000e+00> : vector<64x128xf32>
    %134 = tpu.matmul %131, %133, %cst_23 {dimension_numbers = #tpu.dot_dimension_numbers<[1], [0], [0], [1], [0, 0, 1, 1], [], []>} : vector<64x128xbf16>, vector<128x128xbf16>, vector<64x128xf32> -> vector<64x128xf32>
    %135 = vector.extract_strided_slice %134 {offsets = [0, 0], sizes = [16, 128], strides = [1, 1]} : vector<64x128xf32> to vector<16x128xf32>
    %136 = vector.extract_strided_slice %134 {offsets = [16, 0], sizes = [16, 128], strides = [1, 1]} : vector<64x128xf32> to vector<16x128xf32>
    %137 = arith.minimumf %135, %136 : vector<16x128xf32>
    %138 = vector.extract_strided_slice %134 {offsets = [32, 0], sizes = [16, 128], strides = [1, 1]} : vector<64x128xf32> to vector<16x128xf32>
    %139 = arith.minimumf %137, %138 : vector<16x128xf32>
    %140 = vector.extract_strided_slice %134 {offsets = [48, 0], sizes = [16, 128], strides = [1, 1]} : vector<64x128xf32> to vector<16x128xf32>
    %141 = arith.minimumf %139, %140 : vector<16x128xf32>
    %142 = arith.addf %122, %141 : vector<16x128xf32>
    %143 = vector.extract_strided_slice %0 {offsets = [7, 0, 0], sizes = [1, 4, 16], strides = [1, 1, 1]} : vector<8x4x16xi32> to vector<1x4x16xi32>
    %144 = vector.shape_cast %143 : vector<1x4x16xi32> to vector<4x16xi32>
    %145 = vector.shape_cast %144 : vector<4x16xi32> to vector<4x16x1xi32>
    %146 = vector.broadcast %145 : vector<4x16x1xi32> to vector<4x16x128xi32>
    %147 = arith.cmpi eq, %146, %1 : vector<4x16x128xi32>
    %148 = arith.extui %147 : vector<4x16x128xi1> to vector<4x16x128xi32>
    %149 = arith.sitofp %148 : vector<4x16x128xi32> to vector<4x16x128xf32>
    %150 = arith.truncf %149 : vector<4x16x128xf32> to vector<4x16x128xbf16>
    %151 = vector.shape_cast %150 : vector<4x16x128xbf16> to vector<64x128xbf16>
    %c7 = arith.constant 7 : index
    %c0_24 = arith.constant 0 : index
    %c0_25 = arith.constant 0 : index
    %152 = vector.load %arg2[%c7, %c0_24, %c0_25] : memref<8x128x128xbf16, #tpu.memory_space<vmem>>, vector<1x128x128xbf16>
    %153 = vector.shape_cast %152 : vector<1x128x128xbf16> to vector<128x128xbf16>
    %cst_26 = arith.constant dense<0.000000e+00> : vector<64x128xf32>
    %154 = tpu.matmul %151, %153, %cst_26 {dimension_numbers = #tpu.dot_dimension_numbers<[1], [0], [0], [1], [0, 0, 1, 1], [], []>} : vector<64x128xbf16>, vector<128x128xbf16>, vector<64x128xf32> -> vector<64x128xf32>
    %155 = vector.extract_strided_slice %154 {offsets = [0, 0], sizes = [16, 128], strides = [1, 1]} : vector<64x128xf32> to vector<16x128xf32>
    %156 = vector.extract_strided_slice %154 {offsets = [16, 0], sizes = [16, 128], strides = [1, 1]} : vector<64x128xf32> to vector<16x128xf32>
    %157 = arith.minimumf %155, %156 : vector<16x128xf32>
    %158 = vector.extract_strided_slice %154 {offsets = [32, 0], sizes = [16, 128], strides = [1, 1]} : vector<64x128xf32> to vector<16x128xf32>
    %159 = arith.minimumf %157, %158 : vector<16x128xf32>
    %160 = vector.extract_strided_slice %154 {offsets = [48, 0], sizes = [16, 128], strides = [1, 1]} : vector<64x128xf32> to vector<16x128xf32>
    %161 = arith.minimumf %159, %160 : vector<16x128xf32>
    %162 = arith.addf %142, %161 : vector<16x128xf32>
    %c0_27 = arith.constant 0 : index
    %c0_28 = arith.constant 0 : index
    %163 = vector.load %arg3[%c0_27, %c0_28] : memref<1x128xf32, #tpu.memory_space<vmem>>, vector<1x128xf32>
    %164 = vector.broadcast %163 : vector<1x128xf32> to vector<16x128xf32>
    %165 = arith.addf %162, %164 : vector<16x128xf32>
    %c0_29 = arith.constant 0 : index
    %c0_30 = arith.constant 0 : index
    %166 = vector.load %arg4[%c0_29, %c0_30] : memref<16x128xf32, #tpu.memory_space<vmem>>, vector<16x128xf32>
    tpu.vector_store %arg4[%c0_29, %c0_30], %165 {strides = array<i32>} : memref<16x128xf32, #tpu.memory_space<vmem>>, vector<16x128xf32>,
    return
  }
  func.func @transform_0(%arg0: i32) -> (i32, i32, i32) {
    %c0_i32 = arith.constant 0 : i32
    %c0_i32_0 = arith.constant 0 : i32
    %c0_i32_1 = arith.constant 0 : i32
    return %c0_i32, %c0_i32_0, %arg0 : i32, i32, i32
  }
  func.func @transform_1(%arg0: i32) -> (i32, i32, i32) {
    %c0_i32 = arith.constant 0 : i32
    %c0_i32_0 = arith.constant 0 : i32
    %c0_i32_1 = arith.constant 0 : i32
    %c0_i32_2 = arith.constant 0 : i32
    return %c0_i32, %c0_i32_0, %c0_i32_1 : i32, i32, i32
  }
  func.func @transform_2(%arg0: i32) -> (i32, i32) {
    %c0_i32 = arith.constant 0 : i32
    %c0_i32_0 = arith.constant 0 : i32
    %c0_i32_1 = arith.constant 0 : i32
    return %c0_i32, %c0_i32_0 : i32, i32
  }
  func.func @transform_3(%arg0: i32) -> (i32, i32) {
    %c0_i32 = arith.constant 0 : i32
    %c0_i32_0 = arith.constant 0 : i32
    return %arg0, %c0_i32 : i32, i32
  }
}

</mosaic_0001>

<bundles_post_ra>
// kernel: tpu_custom_call.1
= control target key start
LH: loop header
LB: loop body
LE: loop exit
PB: predicated region body
PF: predicated region fallthrough
CT: control target
= control target key end

     0   :  { %8 = vsyncpa [#allocation3], 0  ;;  %s2602_s0 = inlined_call_operand.hbm [shape: s32[8,4,16], index: 0, kind: input, shape index: {}]   ;;  %s2603_s1 = inlined_call_operand.hbm [shape: bf16[8,128,128], index: 1, kind: input, shape index: {}]   ;;  %s2604_s2 = inlined_call_operand.vmem [shape: f32[1,128], index: 2, kind: input, shape index: {}]   ;;  %s2605_s3 = inlined_call_operand.hbm [shape: f32[16,128], index: 3, kind: output, shape index: {}]  }
   0x1   :  { %9 = vsyncpa [#allocation6], 0 }
   0x2   :  { %10 = vsyncpa [#allocation4], 0  ;;  %s2387_s12 = smov [#allocation2]   ;;  %s2315_s16 = scalar_lea.hbm %s2602_s0, 512 }
   0x3   :  { %s16_s13 = sshll.u32 %s2387_s12, 4  ;;  %p2316_p0 = scmp.ne.s32.totalorder %s2602_s0, %s2315_s16  ;;  %s17_s13 = int_to_ptr.vmem [resolvable:$true] %s16_s13 }
   0x4   :  { %p2319_p1 = scmp.lt.u32.totalorder %s2315_s16, %s2602_s0 }
   0x6   :  { %p2321_p2 = pnand %p2319_p1, %p2316_p0 }
   0x8   :  { %2324 = shalt.err (!%p2321_p2)
}
   0x9   :  { %s2325_s21 = scalar_lea.vmem %s17_s13, 512  ;;  %p2330_p4 = scmp.lt.s32.totalorder %s17_s13, %s17_s13 }
   0xa   :  { %p2326_p3 = scmp.ne.s32.totalorder %s17_s13, %s2325_s21  ;;  %p2331_p5 = scmp.lt.s32.totalorder %s2325_s21, %s2325_s21 }
   0xc   :  { %p2332_p6 = por %p2331_p5, %p2330_p4 }
   0xe   :  { %p2333_p7 = pnand %p2332_p6, %p2326_p3 }
  0x10   :  { %2336 = shalt.err (!%p2333_p7)
}
  0x11   :  { %s2388_s22 = smov 64   ;;  %s2389_s23 = smov 4  }
  0x12   :  { %22 = dma.hbm_to_vmem [thread:$0]  %s2602_s0, 512, %s17_s13, [#allocation3], %s2388_s22, %s2388_s22, %s2389_s23  }
  0x13   :  { %s2390_s26 = smov [#allocation5]   ;;  %s2337_s30 = scalar_lea.hbm %s2603_s1, 8192 }
  0x14   :  { %s28_s27 = sshll.u32 %s2390_s26, 4  ;;  %p2338_p8 = scmp.ne.s32.totalorder %s2603_s1, %s2337_s30  ;;  %s29_s27 = int_to_ptr.vmem [resolvable:$true] %s28_s27 }
  0x15   :  { %p2341_p9 = scmp.lt.u32.totalorder %s2337_s30, %s2603_s1 }
  0x17   :  { %p2343_p10 = pnand %p2341_p9, %p2338_p8 }
  0x19   :  { %2346 = shalt.err (!%p2343_p10)
}
  0x1a   :  { %s2347_s8 = scalar_lea.vmem %s29_s27, 8192  ;;  %p2352_p12 = scmp.lt.s32.totalorder %s29_s27, %s29_s27 }
  0x1b   :  { %p2348_p11 = scmp.ne.s32.totalorder %s29_s27, %s2347_s8  ;;  %p2353_p13 = scmp.lt.s32.totalorder %s2347_s8, %s2347_s8 }
  0x1d   :  { %p2354_p0 = por %p2353_p13, %p2352_p12 }
  0x1f   :  { %p2355_p1 = pnand %p2354_p0, %p2348_p11 }
  0x21   :  { %2358 = shalt.err (!%p2355_p1)
}
  0x22   :  { %34 = dma.hbm_to_vmem [thread:$0]  %s2603_s1, 8192, %s29_s27, [#allocation6], %s2388_s22, %s2388_s22, %s2389_s23  }
  0x23   :  { %2381 = dma.done.wait [#allocation3], 512  }
  0x24   :  { %2382 = vsyncadd [#allocation3], 4294966784 }
  0x25   :  { %2383 = dma.done.wait [#allocation6], 8192  }
  0x26   :  { %2384 = vsyncadd [#allocation6], 4294959104  ;;  %v52_v0 = vlaneseq  ;;  %v44_v4 = vld [vmem:[#allocation2] sm:$0xf]  ;;  %v45_v8 = vld [vmem:[#allocation2 + $0x4] sm:$0xf] }
  0x27   :  { %v2251_v7 = vld [vmem:[#allocation5] sm:$0xff]   ;;  %v2252_v9 = vld [vmem:[#allocation5 + $0x8] sm:$0xff]   ;;  %v2253_v10 = vld [vmem:[#allocation5 + $0x10] sm:$0xff]   ;;  %s2392_s11 = smov [#allocation7]  }
  0x28   :  { %v55_v1 = vshrl.u32 %v52_v0, 7  ;;  %2051 = vmatprep.subr.bf16.mxu0 %v2251_v7  ;;  %v2254_v11 = vld [vmem:[#allocation5 + $0x40] sm:$0xff]   ;;  %v2256_v13 = vld [vmem:[#allocation5 + $0x48] sm:$0xff]   ;;  %v2255_v14 = vld [vmem:[#allocation5 + $0x18] sm:$0xff]   ;;  %s1749_s12 = sshll.u32 %s2392_s11, 4  ;;  %s1750_s12 = int_to_ptr.vmem [resolvable:$true] %s1749_s12 }
  0x29   :  { %2052 = vmatpush3.bf16.msra.mxu0 %v2251_v7  ;;  %2075 = vmatprep.subr.bf16.mxu1 %v2254_v11  ;;  %v2258_v16 = vld [vmem:[#allocation5 + $0x50] sm:$0xff]   ;;  %v2257_v18 = vld [vmem:[#allocation5 + $0x20] sm:$0xff]   ;;  %v2260_v19 = vld [vmem:[#allocation5 + $0x58] sm:$0xff]   ;;  %s2359_s13 = scalar_lea.vmem %s1750_s12, 256  ;;  %p2364_p3 = scmp.lt.s32.totalorder %s1750_s12, %s1750_s12 }
  0x2a   :  { %v2440_v2 = vsub.s32 1, %v55_v1  ;;  %v2442_v3 = vsub.s32 0, %v55_v1  ;;  %2053 = vmatprep.subr.bf16.mxu0 %v2252_v9  ;;  %2076 = vmatpush3.bf16.msra.mxu1 %v2254_v11  ;;  %v2447_v15 = vsub.s32 2, %v55_v1  ;;  %v2451_v21 = vsub.s32 3, %v55_v1  ;;  %v2259_v22 = vld [vmem:[#allocation5 + $0x28] sm:$0xff]   ;;  %v2262_v23 = vld [vmem:[#allocation5 + $0x60] sm:$0xff]   ;;  %p2360_p2 = scmp.ne.s32.totalorder %s1750_s12, %s2359_s13  ;;  %p2365_p4 = scmp.lt.s32.totalorder %s2359_s13, %s2359_s13 }
  0x2b   :  { %2077 = vmatprep.subr.bf16.mxu1 %v2256_v13  ;;  %v2261_v25 = vld [vmem:[#allocation5 + $0x30] sm:$0xff]   ;;  %v2264_v26 = vld [vmem:[#allocation5 + $0x68] sm:$0xff]   ;;  %v2263_v28 = vld [vmem:[#allocation5 + $0x38] sm:$0xff]   ;;  %v2485_v1 = vand.u32 127, %v52_v0 }
  0x2c   :  { %v68_v5 = vrot.slane %v44_v4, %v2440_v2  ;;  %v57_v6 = vrot.slane %v44_v4, %v2442_v3  ;;  %v266_v12 = vrot.slane %v45_v8, %v2442_v3  ;;  %v277_v17 = vrot.slane %v45_v8, %v2440_v2  ;;  %v2265_v29 = vld [vmem:[#allocation5 + $0x70] sm:$0xff]   ;;  %v46_v31 = vld [vmem:[#allocation2 + $0x8] sm:$0xf]  ;;  %v2456_v32 = vld [vmem:[#allocation5 + $0x80] sm:$0xff]   ;;  %p2366_p5 = por %p2365_p4, %p2364_p3 }
  0x2d   :  { %2054 = vmatpush3.bf16.msra.mxu0 %v2252_v9  ;;  %v79_v20 = vrot.slane %v44_v4, %v2447_v15  ;;  %v90_v24 = vrot.slane %v44_v4, %v2451_v21  ;;  %v288_v27 = vrot.slane %v45_v8, %v2447_v15  ;;  %v299_v30 = vrot.slane %v45_v8, %v2451_v21  ;;  %v2267_v33 = vld [vmem:[#allocation5 + $0x78] sm:$0xff]   ;;  %v2460_v35 = vld [vmem:[#allocation5 + $0xc0] sm:$0xff]   ;;  %v47_v37 = vld [vmem:[#allocation2 + $0xc] sm:$0xf] }
  0x2e   :  { %70 = vbcast.lane.b32.xlu1 %v68_v5, 256  ;;  %59 = vbcast.lane.b32.xlu0 %v57_v6, 256  ;;  %v476_v34 = vrot.slane %v46_v31, %v2442_v3  ;;  %v487_v36 = vrot.slane %v46_v31, %v2440_v2  ;;  %v686_v38 = vrot.slane %v47_v37, %v2442_v3  ;;  %v48_v44 = vld [vmem:[#allocation2 + $0x10] sm:$0xf]  ;;  %v49_v47 = vld [vmem:[#allocation2 + $0x14] sm:$0xf]  ;;  %p2367_p6 = pnand %p2366_p5, %p2360_p2 }
  0x2f   :  { %2055 = vmatprep.subr.bf16.mxu0 %v2253_v10  ;;  %2078 = vmatpush3.bf16.msra.mxu1 %v2256_v13  ;;  %v697_v39 = vrot.slane %v47_v37, %v2440_v2  ;;  %v498_v40 = vrot.slane %v46_v31, %v2447_v15  ;;  %v509_v41 = vrot.slane %v46_v31, %v2451_v21  ;;  %v50_v54 = vld [vmem:[#allocation2 + $0x18] sm:$0xf]  ;;  %v51_v57 = vld [vmem:[#allocation2 + $0x1c] sm:$0xf]  ;;  %v2268_v8 = vld [vmem:[#allocation5 + $0x88] sm:$0xff]  }
  0x30   :  { %2079 = vmatprep.subr.bf16.mxu1 %v2258_v16  ;;  %v708_v42 = vrot.slane %v47_v37, %v2447_v15  ;;  %v719_v43 = vrot.slane %v47_v37, %v2451_v21  ;;  %v896_v45 = vrot.slane %v48_v44, %v2442_v3  ;;  %v907_v46 = vrot.slane %v48_v44, %v2440_v2  ;;  %v2269_v9 = vld [vmem:[#allocation5 + $0x90] sm:$0xff]   ;;  %v2271_v13 = vld [vmem:[#allocation5 + $0x98] sm:$0xff]   ;;  %v2284_v37 = vld [vmem:[#allocation5 + $0x108] sm:$0xff]  }
  0x31   :  { %2056 = vmatpush3.bf16.msra.mxu0 %v2253_v10  ;;  %v1106_v48 = vrot.slane %v49_v47, %v2442_v3  ;;  %v1117_v49 = vrot.slane %v49_v47, %v2440_v2  ;;  %v918_v50 = vrot.slane %v48_v44, %v2447_v15  ;;  %v929_v51 = vrot.slane %v48_v44, %v2451_v21  ;;  %v2288_v44 = vld [vmem:[#allocation5 + $0x148] sm:$0xff]  }
  0x32   :  { %74 = vbcast.lane.b32.xlu1 %v68_v5, 264  ;;  %63 = vbcast.lane.b32.xlu0 %v57_v6, 264  ;;  %v1128_v52 = vrot.slane %v49_v47, %v2447_v15  ;;  %v1139_v53 = vrot.slane %v49_v47, %v2451_v21  ;;  %v1316_v55 = vrot.slane %v50_v54, %v2442_v3 }
  0x33   :  { %2057 = vmatprep.subr.bf16.mxu0 %v2255_v14  ;;  %2080 = vmatpush3.bf16.msra.mxu1 %v2258_v16  ;;  %v1327_v56 = vrot.slane %v50_v54, %v2440_v2  ;;  %v1526_v58 = vrot.slane %v51_v57, %v2442_v3  ;;  %v1537_v59 = vrot.slane %v51_v57, %v2440_v2  ;;  %v2391_v2 = vmov 1.0|1.0   ;;  %v2274_v16 = vld [vmem:[#allocation5 + $0xd0] sm:$0xff]  }
  0x34   :  { %2081 = vmatprep.subr.bf16.mxu1 %v2260_v19  ;;  %v1338_v60 = vrot.slane %v50_v54, %v2447_v15  ;;  %v1349_v61 = vrot.slane %v50_v54, %v2451_v21  ;;  %v1548_v3 = vrot.slane %v51_v57, %v2447_v15  ;;  %v1559_v0 = vrot.slane %v51_v57, %v2451_v21  ;;  %v2275_v21 = vld [vmem:[#allocation5 + $0xa8] sm:$0xff]   ;;  %v2293_v57 = vld [vmem:[#allocation5 + $0x130] sm:$0xff]  }
  0x35   :  { %2058 = vmatpush3.bf16.msra.mxu0 %v2255_v14 }
  0x36   :  { %272 = vbcast.lane.b32.xlu1 %v266_v12, 264  ;;  %268 = vbcast.lane.b32.xlu0 %v266_v12, 256  ;;  %v2272_v12 = vld [vmem:[#allocation5 + $0xc8] sm:$0xff]  }
  0x37   :  { %2059 = vmatprep.subr.bf16.mxu0 %v2257_v18  ;;  %2082 = vmatpush3.bf16.msra.mxu1 %v2260_v19 }
  0x38   :  { %2083 = vmatprep.subr.bf16.mxu1 %v2262_v23 }
  0x39   :  { %2060 = vmatpush3.bf16.msra.mxu0 %v2257_v18 }
  0x3a   :  { %283 = vbcast.lane.b32.xlu1 %v277_v17, 264  ;;  %279 = vbcast.lane.b32.xlu0 %v277_v17, 256  ;;  %v2273_v17 = vld [vmem:[#allocation5 + $0xa0] sm:$0xff]  }
  0x3b   :  { %2061 = vmatprep.subr.bf16.mxu0 %v2259_v22  ;;  %2084 = vmatpush3.bf16.msra.mxu1 %v2262_v23 }
  0x3c   :  { %2085 = vmatprep.subr.bf16.mxu1 %v2264_v26 }
  0x3d   :  { %2062 = vmatpush3.bf16.msra.mxu0 %v2259_v22 }
  0x3e   :  { %85 = vbcast.lane.b32.xlu1 %v79_v20, 264  ;;  %81 = vbcast.lane.b32.xlu0 %v79_v20, 256  ;;  %v2276_v20 = vld [vmem:[#allocation5 + $0xd8] sm:$0xff]  }
  0x3f   :  { %2063 = vmatprep.subr.bf16.mxu0 %v2261_v25  ;;  %2086 = vmatpush3.bf16.msra.mxu1 %v2264_v26 }
  0x40   :  { %2087 = vmatprep.subr.bf16.mxu1 %v2265_v29 }
  0x41   :  { %2064 = vmatpush3.bf16.msra.mxu0 %v2261_v25  ;;  %v2277_v25 = vld [vmem:[#allocation5 + $0xb0] sm:$0xff]  }
  0x42   :  { %96 = vbcast.lane.b32.xlu1 %v90_v24, 264  ;;  %92 = vbcast.lane.b32.xlu0 %v90_v24, 256  ;;  %v2278_v24 = vld [vmem:[#allocation5 + $0xe0] sm:$0xff]  }
  0x43   :  { %2065 = vmatprep.subr.bf16.mxu0 %v2263_v28  ;;  %2088 = vmatpush3.bf16.msra.mxu1 %v2265_v29  ;;  %v2279_v29 = vld [vmem:[#allocation5 + $0xb8] sm:$0xff]  }
  0x44   :  { %2089 = vmatprep.subr.bf16.mxu1 %v2267_v33 }
  0x45   :  { %2066 = vmatpush3.bf16.msra.mxu0 %v2263_v28  ;;  %v2280_v28 = vld [vmem:[#allocation5 + $0xe8] sm:$0xff]  }
  0x46   :  { %294 = vbcast.lane.b32.xlu1 %v288_v27, 264  ;;  %290 = vbcast.lane.b32.xlu0 %v288_v27, 256 }
  0x47   :  { %2099 = vmatprep.subr.bf16.mxu0 %v2456_v32  ;;  %2090 = vmatpush3.bf16.msra.mxu1 %v2267_v33  ;;  %v2282_v33 = vld [vmem:[#allocation5 + $0x100] sm:$0xff]  }
  0x48   :  { %2123 = vmatprep.subr.bf16.mxu1 %v2460_v35 }
  0x4a   :  { %305 = vbcast.lane.b32.xlu1 %v299_v30, 264  ;;  %301 = vbcast.lane.b32.xlu0 %v299_v30, 256 }
  0x4e   :  { %482 = vbcast.lane.b32.xlu1 %v476_v34, 264  ;;  %478 = vbcast.lane.b32.xlu0 %v476_v34, 256 }
  0x52   :  { %493 = vbcast.lane.b32.xlu1 %v487_v36, 264  ;;  %489 = vbcast.lane.b32.xlu0 %v487_v36, 256  ;;  %v2283_v36 = vld [vmem:[#allocation5 + $0xf8] sm:$0xff]  }
  0x56   :  { %692 = vbcast.lane.b32.xlu1 %v686_v38, 264  ;;  %688 = vbcast.lane.b32.xlu0 %v686_v38, 256 }
  0x5a   :  { %703 = vbcast.lane.b32.xlu1 %v697_v39, 264  ;;  %699 = vbcast.lane.b32.xlu0 %v697_v39, 256 }
  0x5e   :  { %504 = vbcast.lane.b32.xlu1 %v498_v40, 264  ;;  %500 = vbcast.lane.b32.xlu0 %v498_v40, 256  ;;  %v2286_v40 = vld [vmem:[#allocation5 + $0x140] sm:$0xff]  }
  0x62   :  { %515 = vbcast.lane.b32.xlu1 %v509_v41, 264  ;;  %511 = vbcast.lane.b32.xlu0 %v509_v41, 256  ;;  %v2285_v41 = vld [vmem:[#allocation5 + $0x110] sm:$0xff]  }
  0x66   :  { %714 = vbcast.lane.b32.xlu1 %v708_v42, 264  ;;  %710 = vbcast.lane.b32.xlu0 %v708_v42, 256 }
  0x6a   :  { %725 = vbcast.lane.b32.xlu1 %v719_v43, 264  ;;  %721 = vbcast.lane.b32.xlu0 %v719_v43, 256 }
  0x6e   :  { %902 = vbcast.lane.b32.xlu1 %v896_v45, 264  ;;  %898 = vbcast.lane.b32.xlu0 %v896_v45, 256  ;;  %v2287_v45 = vld [vmem:[#allocation5 + $0x118] sm:$0xff]  }
  0x72   :  { %913 = vbcast.lane.b32.xlu1 %v907_v46, 264  ;;  %909 = vbcast.lane.b32.xlu0 %v907_v46, 256 }
  0x76   :  { %1112 = vbcast.lane.b32.xlu1 %v1106_v48, 264  ;;  %1108 = vbcast.lane.b32.xlu0 %v1106_v48, 256  ;;  %v2290_v48 = vld [vmem:[#allocation5 + $0x150] sm:$0xff]  }
  0x7a   :  { %1123 = vbcast.lane.b32.xlu1 %v1117_v49, 264  ;;  %1119 = vbcast.lane.b32.xlu0 %v1117_v49, 256  ;;  %v2289_v49 = vld [vmem:[#allocation5 + $0x120] sm:$0xff]  }
  0x7e   :  { %924 = vbcast.lane.b32.xlu1 %v918_v50, 264  ;;  %920 = vbcast.lane.b32.xlu0 %v918_v50, 256 }
  0x82   :  { %935 = vbcast.lane.b32.xlu1 %v929_v51, 264  ;;  %931 = vbcast.lane.b32.xlu0 %v929_v51, 256 }
  0x86   :  { %1134 = vbcast.lane.b32.xlu1 %v1128_v52, 264  ;;  %1130 = vbcast.lane.b32.xlu0 %v1128_v52, 256  ;;  %v2292_v52 = vld [vmem:[#allocation5 + $0x158] sm:$0xff]  }
  0x8a   :  { %1145 = vbcast.lane.b32.xlu1 %v1139_v53, 264  ;;  %1141 = vbcast.lane.b32.xlu0 %v1139_v53, 256  ;;  %v2291_v53 = vld [vmem:[#allocation5 + $0x128] sm:$0xff]  }
  0x8e   :  { %1322 = vbcast.lane.b32.xlu1 %v1316_v55, 264  ;;  %1318 = vbcast.lane.b32.xlu0 %v1316_v55, 256 }
  0x92   :  { %1333 = vbcast.lane.b32.xlu1 %v1327_v56, 264  ;;  %1329 = vbcast.lane.b32.xlu0 %v1327_v56, 256  ;;  %v2294_v56 = vld [vmem:[#allocation5 + $0x160] sm:$0xff]  }
  0x96   :  { %1532 = vbcast.lane.b32.xlu1 %v1526_v58, 264  ;;  %1528 = vbcast.lane.b32.xlu0 %v1526_v58, 256 }
  0x9a   :  { %1543 = vbcast.lane.b32.xlu1 %v1537_v59, 264  ;;  %1539 = vbcast.lane.b32.xlu0 %v1537_v59, 256 }
  0x9e   :  { %1344 = vbcast.lane.b32.xlu1 %v1338_v60, 264  ;;  %1340 = vbcast.lane.b32.xlu0 %v1338_v60, 256  ;;  %v2296_v60 = vld [vmem:[#allocation5 + $0x168] sm:$0xff]  }
  0xa0   :  { %v71_v62 = vpop.permute.xlu1 %70  ;;  %v60_v63 = vpop.permute.xlu0 %59 }
  0xa1   :  { %vm100_vm0 = vcmp.eq.s32.totalorder %v71_v62, %v2485_v1  ;;  %vm98_vm3 = vcmp.eq.s32.totalorder %v60_v63, %v2485_v1 }
  0xa2   :  { %1355 = vbcast.lane.b32.xlu1 %v1349_v61, 264  ;;  %1351 = vbcast.lane.b32.xlu0 %v1349_v61, 256  ;;  %v2295_v61 = vld [vmem:[#allocation5 + $0x138] sm:$0xff]  }
  0xa4   :  { %v75_v4 = vpop.permute.xlu1 %74  ;;  %v64_v5 = vpop.permute.xlu0 %63 }
  0xa5   :  { %vm101_vm1 = vcmp.eq.s32.totalorder %v75_v4, %v2485_v1  ;;  %vm99_vm2 = vcmp.eq.s32.totalorder %v64_v5, %v2485_v1  ;;  %v2298_v4 = vld [vmem:[#allocation5 + $0x180] sm:$0xff]  }
  0xa6   :  { %vm1780_vm4 = vmpackc.low %vm101_vm1, %vm100_vm0  ;;  %1554 = vbcast.lane.b32.xlu1 %v1548_v3, 264  ;;  %1550 = vbcast.lane.b32.xlu0 %v1548_v3, 256  ;;  %v2297_v3 = vld [vmem:[#allocation5 + $0x170] sm:$0xff]  }
  0xa7   :  { %vm1778_vm5 = vmpackc.low %vm99_vm2, %vm98_vm3 }
  0xa8   :  { %2067 = vmatprep.mubr.msk.bf16.mxu0 %vm1778_vm5, %v2391_v2  ;;  %v273_v6 = vpop.permute.xlu1 %272  ;;  %v269_v7 = vpop.permute.xlu0 %268 }
  0xa9   :  { %vm308_vm6 = vcmp.eq.s32.totalorder %v273_v6, %v2485_v1  ;;  %2068 = vmatmul.mubr.msk.bf16.vlgmr.msra.gmra.mrb[0].mxu0 %vm1780_vm4, %v2391_v2  ;;  %vm307_vm7 = vcmp.eq.s32.totalorder %v269_v7, %v2485_v1  ;;  %v2299_v6 = vld [vmem:[#allocation5 + $0x178] sm:$0xff]   ;;  %v2300_v7 = vld [vmem:[#allocation5 + $0x188] sm:$0xff]  }
  0xaa   :  { %2100 = vmatpush3.bf16.msra.mxu0 %v2456_v32  ;;  %1565 = vbcast.lane.b32.xlu1 %v1559_v0, 264  ;;  %vm1802_vm8 = vmpackc.low %vm308_vm6, %vm307_vm7  ;;  %v2281_v32 = vld [vmem:[#allocation5 + $0xf0] sm:$0xff]  }
  0xab   :  { %1561 = vbcast.lane.b32.xlu0 %v1559_v0, 256  ;;  %2091 = vmatprep.mubr.msk.bf16.mxu1 %vm1802_vm8, %v2391_v2 }
  0xac   :  { %2101 = vmatprep.subr.bf16.mxu0 %v2268_v8  ;;  %v284_v10 = vpop.permute.xlu1 %283  ;;  %v280_v11 = vpop.permute.xlu0 %279 }
  0xad   :  { %vm310_vm9 = vcmp.eq.s32.totalorder %v284_v10, %v2485_v1  ;;  %vm309_vm10 = vcmp.eq.s32.totalorder %v280_v11, %v2485_v1  ;;  %v2302_v10 = vld [vmem:[#allocation5 + $0x1c0] sm:$0xff]   ;;  %v2301_v11 = vld [vmem:[#allocation5 + $0x190] sm:$0xff]  }
  0xae   :  { %2102 = vmatpush3.bf16.msra.mxu0 %v2268_v8  ;;  %vm1804_vm11 = vmpackc.low %vm310_vm9, %vm309_vm10 }
  0xaf   :  { %2092 = vmatmul.mubr.msk.bf16.vlgmr.msra.gmra.mrb[0].mxu1 %vm1804_vm11, %v2391_v2  ;;  %2103 = vmatprep.subr.bf16.mxu0 %v2269_v9 }
  0xb0   :  { %v86_v14 = vpop.permute.xlu1 %85  ;;  %2124 = vmatpush3.bf16.msra.mxu1 %v2460_v35  ;;  %v82_v15 = vpop.permute.xlu0 %81 }
  0xb1   :  { %vm103_vm12 = vcmp.eq.s32.totalorder %v86_v14, %v2485_v1  ;;  %vm102_vm13 = vcmp.eq.s32.totalorder %v82_v15, %v2485_v1  ;;  %2125 = vmatprep.subr.bf16.mxu1 %v2272_v12  ;;  %v2304_v14 = vld [vmem:[#allocation5 + $0x1c8] sm:$0xff]   ;;  %v2303_v15 = vld [vmem:[#allocation5 + $0x198] sm:$0xff]  }
  0xb2   :  { %2104 = vmatpush3.bf16.msra.mxu0 %v2269_v9  ;;  %vm1782_vm14 = vmpackc.low %vm103_vm12, %vm102_vm13 }
  0xb3   :  { %2071 = vmatprep.mubr.msk.bf16.mxu0 %vm1782_vm14, %v2391_v2  ;;  %2105 = vmatprep.subr.bf16.mxu0 %v2271_v13 }
  0xb4   :  { %v97_v18 = vpop.permute.xlu1 %96  ;;  %2126 = vmatpush3.bf16.msra.mxu1 %v2272_v12  ;;  %v93_v19 = vpop.permute.xlu0 %92 }
  0xb5   :  { %vm105_vm15 = vcmp.eq.s32.totalorder %v97_v18, %v2485_v1  ;;  %vm104_vm0 = vcmp.eq.s32.totalorder %v93_v19, %v2485_v1  ;;  %2127 = vmatprep.subr.bf16.mxu1 %v2274_v16  ;;  %v2306_v18 = vld [vmem:[#allocation5 + $0x1d0] sm:$0xff]   ;;  %v2305_v19 = vld [vmem:[#allocation5 + $0x1a0] sm:$0xff]  }
  0xb6   :  { %2106 = vmatpush3.bf16.msra.mxu0 %v2271_v13  ;;  %vm1784_vm1 = vmpackc.low %vm105_vm15, %vm104_vm0 }
  0xb7   :  { %2072 = vmatmul.mubr.msk.bf16.gmra.mrb[4].mxu0 %vm1784_vm1, %v2391_v2  ;;  %2107 = vmatprep.subr.bf16.mxu0 %v2273_v17 }
  0xb8   :  { %v295_v22 = vpop.permute.xlu1 %294  ;;  %2128 = vmatpush3.bf16.msra.mxu1 %v2274_v16  ;;  %v291_v23 = vpop.permute.xlu0 %290 }
  0xb9   :  { %vm312_vm2 = vcmp.eq.s32.totalorder %v295_v22, %v2485_v1  ;;  %vm311_vm3 = vcmp.eq.s32.totalorder %v291_v23, %v2485_v1  ;;  %2129 = vmatprep.subr.bf16.mxu1 %v2276_v20  ;;  %v2308_v22 = vld [vmem:[#allocation5 + $0x1d8] sm:$0xff]   ;;  %v2307_v23 = vld [vmem:[#allocation5 + $0x1a8] sm:$0xff]  }
  0xba   :  { %2108 = vmatpush3.bf16.msra.mxu0 %v2273_v17  ;;  %vm1806_vm4 = vmpackc.low %vm312_vm2, %vm311_vm3 }
  0xbb   :  { %2095 = vmatprep.mubr.msk.bf16.mxu1 %vm1806_vm4, %v2391_v2  ;;  %2109 = vmatprep.subr.bf16.mxu0 %v2275_v21 }
  0xbc   :  { %v306_v26 = vpop.permute.xlu1 %305  ;;  %2130 = vmatpush3.bf16.msra.mxu1 %v2276_v20  ;;  %v302_v27 = vpop.permute.xlu0 %301 }
  0xbd   :  { %vm314_vm5 = vcmp.eq.s32.totalorder %v306_v26, %v2485_v1  ;;  %vm313_vm6 = vcmp.eq.s32.totalorder %v302_v27, %v2485_v1  ;;  %2131 = vmatprep.subr.bf16.mxu1 %v2278_v24  ;;  %v2310_v26 = vld [vmem:[#allocation5 + $0x1e0] sm:$0xff]   ;;  %v2309_v27 = vld [vmem:[#allocation5 + $0x1b0] sm:$0xff]  }
  0xbe   :  { %2110 = vmatpush3.bf16.msra.mxu0 %v2275_v21  ;;  %vm1808_vm7 = vmpackc.low %vm314_vm5, %vm313_vm6 }
  0xbf   :  { %2096 = vmatmul.mubr.msk.bf16.gmra.mrb[4].mxu1 %vm1808_vm7, %v2391_v2  ;;  %2111 = vmatprep.subr.bf16.mxu0 %v2277_v25 }
  0xc0   :  { %v483_v30 = vpop.permute.xlu1 %482  ;;  %2132 = vmatpush3.bf16.msra.mxu1 %v2278_v24  ;;  %v479_v31 = vpop.permute.xlu0 %478 }
  0xc1   :  { %vm518_vm8 = vcmp.eq.s32.totalorder %v483_v30, %v2485_v1  ;;  %vm517_vm9 = vcmp.eq.s32.totalorder %v479_v31, %v2485_v1  ;;  %2133 = vmatprep.subr.bf16.mxu1 %v2280_v28  ;;  %v2312_v30 = vld [vmem:[#allocation5 + $0x1e8] sm:$0xff]   ;;  %v2311_v31 = vld [vmem:[#allocation5 + $0x1b8] sm:$0xff]  }
  0xc2   :  { %2112 = vmatpush3.bf16.msra.mxu0 %v2277_v25  ;;  %vm1826_vm10 = vmpackc.low %vm518_vm8, %vm517_vm9 }
  0xc3   :  { %2113 = vmatprep.subr.bf16.mxu0 %v2279_v29  ;;  %2115 = vmatprep.mubr.msk.bf16.mxu0 %vm1826_vm10, %v2391_v2 }
  0xc4   :  { %v494_v34 = vpop.permute.xlu1 %493  ;;  %2134 = vmatpush3.bf16.msra.mxu1 %v2280_v28  ;;  %v490_v35 = vpop.permute.xlu0 %489 }
  0xc5   :  { %vm520_vm11 = vcmp.eq.s32.totalorder %v494_v34, %v2485_v1  ;;  %vm519_vm12 = vcmp.eq.s32.totalorder %v490_v35, %v2485_v1  ;;  %2135 = vmatprep.subr.bf16.mxu1 %v2281_v32  ;;  %v2313_v34 = vld [vmem:[#allocation5 + $0x1f0] sm:$0xff]  }
  0xc6   :  { %2114 = vmatpush3.bf16.msra.mxu0 %v2279_v29  ;;  %vm1828_vm13 = vmpackc.low %vm520_vm11, %vm519_vm12 }
  0xc7   :  { %2147 = vmatprep.subr.bf16.mxu0 %v2282_v33 }
  0xc8   :  { %v693_v38 = vpop.permute.xlu1 %692  ;;  %2136 = vmatpush3.bf16.msra.mxu1 %v2281_v32  ;;  %v689_v39 = vpop.permute.xlu0 %688 }
  0xc9   :  { %2116 = vmatmul.mubr.msk.bf16.vlgmr.msra.gmra.mrb[8].mxu0 %vm1828_vm13, %v2391_v2  ;;  %vm728_vm14 = vcmp.eq.s32.totalorder %v693_v38, %v2485_v1  ;;  %vm727_vm15 = vcmp.eq.s32.totalorder %v689_v39, %v2485_v1  ;;  %2137 = vmatprep.subr.bf16.mxu1 %v2283_v36 }
  0xca   :  { %2148 = vmatpush3.bf16.msra.mxu0 %v2282_v33  ;;  %vm1850_vm0 = vmpackc.low %vm728_vm14, %vm727_vm15 }
  0xcb   :  { %2139 = vmatprep.mubr.msk.bf16.mxu1 %vm1850_vm0, %v2391_v2  ;;  %2149 = vmatprep.subr.bf16.mxu0 %v2284_v37 }
  0xcc   :  { %v704_v42 = vpop.permute.xlu1 %703  ;;  %2138 = vmatpush3.bf16.msra.mxu1 %v2283_v36  ;;  %v700_v43 = vpop.permute.xlu0 %699 }
  0xcd   :  { %vm730_vm1 = vcmp.eq.s32.totalorder %v704_v42, %v2485_v1  ;;  %vm729_vm2 = vcmp.eq.s32.totalorder %v700_v43, %v2485_v1  ;;  %2171 = vmatprep.subr.bf16.mxu1 %v2286_v40 }
  0xce   :  { %2150 = vmatpush3.bf16.msra.mxu0 %v2284_v37  ;;  %vm1852_vm3 = vmpackc.low %vm730_vm1, %vm729_vm2  ;;  %v2314_v37 = vld [vmem:[#allocation5 + $0x1f8] sm:$0xff]  }
  0xcf   :  { %2140 = vmatmul.mubr.msk.bf16.vlgmr.msra.gmra.mrb[8].mxu1 %vm1852_vm3, %v2391_v2  ;;  %2151 = vmatprep.subr.bf16.mxu0 %v2285_v41 }
  0xd0   :  { %v505_v46 = vpop.permute.xlu1 %504  ;;  %2172 = vmatpush3.bf16.msra.mxu1 %v2286_v40  ;;  %v501_v47 = vpop.permute.xlu0 %500 }
  0xd1   :  { %vm522_vm4 = vcmp.eq.s32.totalorder %v505_v46, %v2485_v1  ;;  %vm521_vm5 = vcmp.eq.s32.totalorder %v501_v47, %v2485_v1  ;;  %2173 = vmatprep.subr.bf16.mxu1 %v2288_v44 }
  0xd2   :  { %2152 = vmatpush3.bf16.msra.mxu0 %v2285_v41  ;;  %vm1830_vm6 = vmpackc.low %vm522_vm4, %vm521_vm5 }
  0xd3   :  { %2119 = vmatprep.mubr.msk.bf16.mxu0 %vm1830_vm6, %v2391_v2  ;;  %2153 = vmatprep.subr.bf16.mxu0 %v2287_v45 }
  0xd4   :  { %v516_v50 = vpop.permute.xlu1 %515  ;;  %2174 = vmatpush3.bf16.msra.mxu1 %v2288_v44  ;;  %v512_v51 = vpop.permute.xlu0 %511 }
  0xd5   :  { %vm524_vm7 = vcmp.eq.s32.totalorder %v516_v50, %v2485_v1  ;;  %vm523_vm8 = vcmp.eq.s32.totalorder %v512_v51, %v2485_v1  ;;  %2175 = vmatprep.subr.bf16.mxu1 %v2290_v48 }
  0xd6   :  { %2154 = vmatpush3.bf16.msra.mxu0 %v2287_v45  ;;  %vm1832_vm9 = vmpackc.low %vm524_vm7, %vm523_vm8 }
  0xd7   :  { %2120 = vmatmul.mubr.msk.bf16.gmra.mrb[12].mxu0 %vm1832_vm9, %v2391_v2  ;;  %2155 = vmatprep.subr.bf16.mxu0 %v2289_v49 }
  0xd8   :  { %v715_v54 = vpop.permute.xlu1 %714  ;;  %2176 = vmatpush3.bf16.msra.mxu1 %v2290_v48  ;;  %v711_v55 = vpop.permute.xlu0 %710 }
  0xd9   :  { %vm732_vm10 = vcmp.eq.s32.totalorder %v715_v54, %v2485_v1  ;;  %vm731_vm11 = vcmp.eq.s32.totalorder %v711_v55, %v2485_v1  ;;  %2177 = vmatprep.subr.bf16.mxu1 %v2292_v52 }
  0xda   :  { %2156 = vmatpush3.bf16.msra.mxu0 %v2289_v49  ;;  %vm1854_vm12 = vmpackc.low %vm732_vm10, %vm731_vm11 }
  0xdb   :  { %2143 = vmatprep.mubr.msk.bf16.mxu1 %vm1854_vm12, %v2391_v2  ;;  %2157 = vmatprep.subr.bf16.mxu0 %v2291_v53 }
  0xdc   :  { %v726_v58 = vpop.permute.xlu1 %725  ;;  %2178 = vmatpush3.bf16.msra.mxu1 %v2292_v52  ;;  %v722_v59 = vpop.permute.xlu0 %721 }
  0xdd   :  { %vm734_vm13 = vcmp.eq.s32.totalorder %v726_v58, %v2485_v1  ;;  %vm733_vm14 = vcmp.eq.s32.totalorder %v722_v59, %v2485_v1  ;;  %2179 = vmatprep.subr.bf16.mxu1 %v2294_v56 }
  0xde   :  { %2158 = vmatpush3.bf16.msra.mxu0 %v2291_v53  ;;  %vm1856_vm15 = vmpackc.low %vm734_vm13, %vm733_vm14 }
  0xdf   :  { %2144 = vmatmul.mubr.msk.bf16.gmra.mrb[12].mxu1 %vm1856_vm15, %v2391_v2  ;;  %2159 = vmatprep.subr.bf16.mxu0 %v2293_v57 }
  0xe0   :  { %v903_v62 = vpop.permute.xlu1 %902  ;;  %2180 = vmatpush3.bf16.msra.mxu1 %v2294_v56  ;;  %v899_v63 = vpop.permute.xlu0 %898 }
  0xe1   :  { %vm938_vm0 = vcmp.eq.s32.totalorder %v903_v62, %v2485_v1  ;;  %vm937_vm1 = vcmp.eq.s32.totalorder %v899_v63, %v2485_v1  ;;  %2181 = vmatprep.subr.bf16.mxu1 %v2296_v60 }
  0xe2   :  { %2160 = vmatpush3.bf16.msra.mxu0 %v2293_v57  ;;  %vm1874_vm2 = vmpackc.low %vm938_vm0, %vm937_vm1 }
  0xe3   :  { %2161 = vmatprep.subr.bf16.mxu0 %v2295_v61  ;;  %2163 = vmatprep.mubr.msk.bf16.mxu0 %vm1874_vm2, %v2391_v2 }
  0xe4   :  { %v914_v5 = vpop.permute.xlu1 %913  ;;  %2182 = vmatpush3.bf16.msra.mxu1 %v2296_v60  ;;  %v910_v0 = vpop.permute.xlu0 %909 }
  0xe5   :  { %vm940_vm3 = vcmp.eq.s32.totalorder %v914_v5, %v2485_v1  ;;  %vm939_vm4 = vcmp.eq.s32.totalorder %v910_v0, %v2485_v1  ;;  %2183 = vmatprep.subr.bf16.mxu1 %v2297_v3 }
  0xe6   :  { %2162 = vmatpush3.bf16.msra.mxu0 %v2295_v61  ;;  %vm1876_vm5 = vmpackc.low %vm940_vm3, %vm939_vm4 }
  0xe7   :  { %2195 = vmatprep.subr.bf16.mxu0 %v2298_v4 }
  0xe8   :  { %v1113_v8 = vpop.permute.xlu1 %1112  ;;  %2184 = vmatpush3.bf16.msra.mxu1 %v2297_v3  ;;  %v1109_v9 = vpop.permute.xlu0 %1108 }
  0xe9   :  { %2164 = vmatmul.mubr.msk.bf16.vlgmr.msra.gmra.mrb[16].mxu0 %vm1876_vm5, %v2391_v2  ;;  %vm1148_vm6 = vcmp.eq.s32.totalorder %v1113_v8, %v2485_v1  ;;  %vm1147_vm7 = vcmp.eq.s32.totalorder %v1109_v9, %v2485_v1  ;;  %2185 = vmatprep.subr.bf16.mxu1 %v2299_v6 }
  0xea   :  { %2196 = vmatpush3.bf16.msra.mxu0 %v2298_v4  ;;  %vm1898_vm8 = vmpackc.low %vm1148_vm6, %vm1147_vm7 }
  0xeb   :  { %2187 = vmatprep.mubr.msk.bf16.mxu1 %vm1898_vm8, %v2391_v2  ;;  %2197 = vmatprep.subr.bf16.mxu0 %v2300_v7 }
  0xec   :  { %v1124_v12 = vpop.permute.xlu1 %1123  ;;  %2186 = vmatpush3.bf16.msra.mxu1 %v2299_v6  ;;  %v1120_v13 = vpop.permute.xlu0 %1119 }
  0xed   :  { %vm1150_vm9 = vcmp.eq.s32.totalorder %v1124_v12, %v2485_v1  ;;  %vm1149_vm10 = vcmp.eq.s32.totalorder %v1120_v13, %v2485_v1  ;;  %2219 = vmatprep.subr.bf16.mxu1 %v2302_v10 }
  0xee   :  { %2198 = vmatpush3.bf16.msra.mxu0 %v2300_v7  ;;  %vm1900_vm11 = vmpackc.low %vm1150_vm9, %vm1149_vm10 }
  0xef   :  { %2188 = vmatmul.mubr.msk.bf16.vlgmr.msra.gmra.mrb[16].mxu1 %vm1900_vm11, %v2391_v2  ;;  %2199 = vmatprep.subr.bf16.mxu0 %v2301_v11 }
  0xf0   :  { %v925_v16 = vpop.permute.xlu1 %924  ;;  %2220 = vmatpush3.bf16.msra.mxu1 %v2302_v10  ;;  %v921_v17 = vpop.permute.xlu0 %920 }
  0xf1   :  { %vm942_vm12 = vcmp.eq.s32.totalorder %v925_v16, %v2485_v1  ;;  %vm941_vm13 = vcmp.eq.s32.totalorder %v921_v17, %v2485_v1  ;;  %2221 = vmatprep.subr.bf16.mxu1 %v2304_v14 }
  0xf2   :  { %2200 = vmatpush3.bf16.msra.mxu0 %v2301_v11  ;;  %vm1878_vm14 = vmpackc.low %vm942_vm12, %vm941_vm13 }
  0xf3   :  { %2167 = vmatprep.mubr.msk.bf16.mxu0 %vm1878_vm14, %v2391_v2  ;;  %2201 = vmatprep.subr.bf16.mxu0 %v2303_v15 }
  0xf4   :  { %v936_v20 = vpop.permute.xlu1 %935  ;;  %2222 = vmatpush3.bf16.msra.mxu1 %v2304_v14  ;;  %v932_v21 = vpop.permute.xlu0 %931 }
  0xf5   :  { %vm944_vm15 = vcmp.eq.s32.totalorder %v936_v20, %v2485_v1  ;;  %vm943_vm0 = vcmp.eq.s32.totalorder %v932_v21, %v2485_v1  ;;  %2223 = vmatprep.subr.bf16.mxu1 %v2306_v18 }
  0xf6   :  { %2202 = vmatpush3.bf16.msra.mxu0 %v2303_v15  ;;  %vm1880_vm1 = vmpackc.low %vm944_vm15, %vm943_vm0 }
  0xf7   :  { %2168 = vmatmul.mubr.msk.bf16.gmra.mrb[20].mxu0 %vm1880_vm1, %v2391_v2  ;;  %2203 = vmatprep.subr.bf16.mxu0 %v2305_v19 }
  0xf8   :  { %v1135_v24 = vpop.permute.xlu1 %1134  ;;  %2224 = vmatpush3.bf16.msra.mxu1 %v2306_v18  ;;  %v1131_v25 = vpop.permute.xlu0 %1130 }
  0xf9   :  { %vm1152_vm2 = vcmp.eq.s32.totalorder %v1135_v24, %v2485_v1  ;;  %vm1151_vm3 = vcmp.eq.s32.totalorder %v1131_v25, %v2485_v1  ;;  %2225 = vmatprep.subr.bf16.mxu1 %v2308_v22 }
  0xfa   :  { %2204 = vmatpush3.bf16.msra.mxu0 %v2305_v19  ;;  %vm1902_vm4 = vmpackc.low %vm1152_vm2, %vm1151_vm3 }
  0xfb   :  { %2191 = vmatprep.mubr.msk.bf16.mxu1 %vm1902_vm4, %v2391_v2  ;;  %2205 = vmatprep.subr.bf16.mxu0 %v2307_v23 }
  0xfc   :  { %v1146_v28 = vpop.permute.xlu1 %1145  ;;  %2226 = vmatpush3.bf16.msra.mxu1 %v2308_v22  ;;  %v1142_v29 = vpop.permute.xlu0 %1141 }
  0xfd   :  { %vm1154_vm5 = vcmp.eq.s32.totalorder %v1146_v28, %v2485_v1  ;;  %vm1153_vm6 = vcmp.eq.s32.totalorder %v1142_v29, %v2485_v1  ;;  %2227 = vmatprep.subr.bf16.mxu1 %v2310_v26 }
  0xfe   :  { %2206 = vmatpush3.bf16.msra.mxu0 %v2307_v23  ;;  %vm1904_vm7 = vmpackc.low %vm1154_vm5, %vm1153_vm6 }
  0xff   :  { %2192 = vmatmul.mubr.msk.bf16.gmra.mrb[20].mxu1 %vm1904_vm7, %v2391_v2  ;;  %2207 = vmatprep.subr.bf16.mxu0 %v2309_v27 }
 0x100   :  { %v1323_v32 = vpop.permute.xlu1 %1322  ;;  %2228 = vmatpush3.bf16.msra.mxu1 %v2310_v26  ;;  %v1319_v33 = vpop.permute.xlu0 %1318 }
 0x101   :  { %vm1358_vm8 = vcmp.eq.s32.totalorder %v1323_v32, %v2485_v1  ;;  %vm1357_vm9 = vcmp.eq.s32.totalorder %v1319_v33, %v2485_v1  ;;  %2229 = vmatprep.subr.bf16.mxu1 %v2312_v30 }
 0x102   :  { %2208 = vmatpush3.bf16.msra.mxu0 %v2309_v27  ;;  %vm1922_vm10 = vmpackc.low %vm1358_vm8, %vm1357_vm9 }
 0x103   :  { %2209 = vmatprep.subr.bf16.mxu0 %v2311_v31  ;;  %2211 = vmatprep.mubr.msk.bf16.mxu0 %vm1922_vm10, %v2391_v2 }
 0x104   :  { %v1334_v35 = vpop.permute.xlu1 %1333  ;;  %2230 = vmatpush3.bf16.msra.mxu1 %v2312_v30  ;;  %v1330_v36 = vpop.permute.xlu0 %1329 }
 0x105   :  { %vm1360_vm11 = vcmp.eq.s32.totalorder %v1334_v35, %v2485_v1  ;;  %vm1359_vm12 = vcmp.eq.s32.totalorder %v1330_v36, %v2485_v1  ;;  %2231 = vmatprep.subr.bf16.mxu1 %v2313_v34 }
 0x106   :  { %2210 = vmatpush3.bf16.msra.mxu0 %v2311_v31  ;;  %vm1924_vm13 = vmpackc.low %vm1360_vm11, %vm1359_vm12 }
 0x108   :  { %v1533_v38 = vpop.permute.xlu1 %1532  ;;  %2232 = vmatpush3.bf16.msra.mxu1 %v2313_v34  ;;  %v1529_v39 = vpop.permute.xlu0 %1528 }
 0x109   :  { %2212 = vmatmul.mubr.msk.bf16.vlgmr.msra.gmra.mrb[24].mxu0 %vm1924_vm13, %v2391_v2  ;;  %vm1568_vm14 = vcmp.eq.s32.totalorder %v1533_v38, %v2485_v1  ;;  %vm1567_vm15 = vcmp.eq.s32.totalorder %v1529_v39, %v2485_v1  ;;  %2233 = vmatprep.subr.bf16.mxu1 %v2314_v37 }
 0x10a   :  { %vm1946_vm0 = vmpackc.low %vm1568_vm14, %vm1567_vm15 }
 0x10b   :  { %2235 = vmatprep.mubr.msk.bf16.mxu1 %vm1946_vm0, %v2391_v2 }
 0x10c   :  { %v1544_v40 = vpop.permute.xlu1 %1543  ;;  %2234 = vmatpush3.bf16.msra.mxu1 %v2314_v37  ;;  %v1540_v41 = vpop.permute.xlu0 %1539 }
 0x10d   :  { %vm1570_vm1 = vcmp.eq.s32.totalorder %v1544_v40, %v2485_v1  ;;  %vm1569_vm2 = vcmp.eq.s32.totalorder %v1540_v41, %v2485_v1 }
 0x10e   :  { %vm1948_vm3 = vmpackc.low %vm1570_vm1, %vm1569_vm2 }
 0x10f   :  { %2236 = vmatmul.mubr.msk.bf16.vlgmr.msra.gmra.mrb[24].mxu1 %vm1948_vm3, %v2391_v2 }
 0x110   :  { %v1345_v42 = vpop.permute.xlu1 %1344  ;;  %v1341_v43 = vpop.permute.xlu0 %1340 }
 0x111   :  { %vm1362_vm4 = vcmp.eq.s32.totalorder %v1345_v42, %v2485_v1  ;;  %vm1361_vm5 = vcmp.eq.s32.totalorder %v1341_v43, %v2485_v1 }
 0x112   :  { %vm1926_vm6 = vmpackc.low %vm1362_vm4, %vm1361_vm5 }
 0x113   :  { %2215 = vmatprep.mubr.msk.bf16.mxu0 %vm1926_vm6, %v2391_v2 }
 0x114   :  { %v1356_v44 = vpop.permute.xlu1 %1355  ;;  %v1352_v45 = vpop.permute.xlu0 %1351 }
 0x115   :  { %vm1364_vm7 = vcmp.eq.s32.totalorder %v1356_v44, %v2485_v1  ;;  %vm1363_vm8 = vcmp.eq.s32.totalorder %v1352_v45, %v2485_v1 }
 0x116   :  { %vm1928_vm9 = vmpackc.low %vm1364_vm7, %vm1363_vm8 }
 0x117   :  { %2216 = vmatmul.mubr.msk.bf16.gmra.mrb[28].mxu0 %vm1928_vm9, %v2391_v2 }
 0x118   :  { %v1555_v46 = vpop.permute.xlu1 %1554  ;;  %v1551_v47 = vpop.permute.xlu0 %1550 }
 0x119   :  { %vm1572_vm10 = vcmp.eq.s32.totalorder %v1555_v46, %v2485_v1  ;;  %vm1571_vm11 = vcmp.eq.s32.totalorder %v1551_v47, %v2485_v1 }
 0x11a   :  { %vm1950_vm12 = vmpackc.low %vm1572_vm10, %vm1571_vm11 }
 0x11b   :  { %2239 = vmatprep.mubr.msk.bf16.mxu1 %vm1950_vm12, %v2391_v2 }
 0x11c   :  { %v1566_v48 = vpop.permute.xlu1 %1565 }
 0x11d   :  { %vm1574_vm13 = vcmp.eq.s32.totalorder %v1566_v48, %v2485_v1  ;;  %v1562_v49 = vpop.permute.xlu0 %1561 }
 0x11e   :  { %vm1573_vm14 = vcmp.eq.s32.totalorder %v1562_v49, %v2485_v1 }
 0x11f   :  { %vm1952_vm15 = vmpackc.low %vm1574_vm13, %vm1573_vm14 }
 0x120   :  { %2240 = vmatmul.mubr.msk.bf16.gmra.mrb[28].mxu1 %vm1952_vm15, %v2391_v2 }
 0x17c   :  { %v2069_v50 = vpop.f32.mrb[0].mxu0 }
 0x17d   :  { %v224_v51 = vpop.f32.mrb[1].mxu0 }
 0x17e   :  { %v255_v52 = vmin.f32 %v224_v51, %v2069_v50  ;;  %v2070_v53 = vpop.f32.mrb[2].mxu0 }
 0x17f   :  { %v227_v54 = vpop.f32.mrb[3].mxu0 }
 0x180   :  { %v256_v55 = vmin.f32 %v227_v54, %v2070_v53 }
 0x182   :  { %v2093_v56 = vpop.f32.mrb[0].mxu1 }
 0x183   :  { %v434_v57 = vpop.f32.mrb[1].mxu1 }
 0x184   :  { %v465_v58 = vmin.f32 %v434_v57, %v2093_v56  ;;  %v2094_v59 = vpop.f32.mrb[2].mxu1 }
 0x185   :  { %v437_v60 = vpop.f32.mrb[3].mxu1 }
 0x186   :  { %v466_v61 = vmin.f32 %v437_v60, %v2094_v59 }
 0x18a   :  { %v2073_v62 = vpop.f32.mrb[4].mxu0 }
 0x18b   :  { %v240_v63 = vpop.f32.mrb[5].mxu0 }
 0x18c   :  { %v257_v3 = vmin.f32 %v255_v52, %v240_v63  ;;  %v2074_v4 = vpop.f32.mrb[6].mxu0 }
 0x18d   :  { %v243_v1 = vpop.f32.mrb[7].mxu0 }
 0x18e   :  { %v259_v5 = vmin.f32 %v257_v3, %v2073_v62  ;;  %v258_v0 = vmin.f32 %v256_v55, %v243_v1 }
 0x190   :  { %v260_v2 = vmin.f32 %v258_v0, %v2074_v4 }
 0x192   :  { %v2097_v6 = vpop.f32.mrb[4].mxu1 }
 0x193   :  { %v450_v7 = vpop.f32.mrb[5].mxu1 }
 0x194   :  { %v467_v8 = vmin.f32 %v465_v58, %v450_v7  ;;  %v2098_v9 = vpop.f32.mrb[6].mxu1 }
 0x195   :  { %v453_v10 = vpop.f32.mrb[7].mxu1 }
 0x196   :  { %v469_v11 = vmin.f32 %v467_v8, %v2097_v6  ;;  %v468_v12 = vmin.f32 %v466_v61, %v453_v10 }
 0x198   :  { %v471_v13 = vadd.f32 %v469_v11, %v259_v5  ;;  %v470_v14 = vmin.f32 %v468_v12, %v2098_v9 }
 0x19a   :  { %v472_v15 = vadd.f32 %v470_v14, %v260_v2 }
 0x19c   :  { %v2117_v16 = vpop.f32.mrb[8].mxu0 }
 0x19d   :  { %v644_v17 = vpop.f32.mrb[9].mxu0 }
 0x19e   :  { %v675_v18 = vmin.f32 %v644_v17, %v2117_v16  ;;  %v2118_v19 = vpop.f32.mrb[10].mxu0 }
 0x19f   :  { %v647_v20 = vpop.f32.mrb[11].mxu0 }
 0x1a0   :  { %v676_v21 = vmin.f32 %v647_v20, %v2118_v19 }
 0x1a2   :  { %v2141_v22 = vpop.f32.mrb[8].mxu1 }
 0x1a3   :  { %v854_v23 = vpop.f32.mrb[9].mxu1 }
 0x1a4   :  { %v885_v24 = vmin.f32 %v854_v23, %v2141_v22  ;;  %v2142_v25 = vpop.f32.mrb[10].mxu1 }
 0x1a5   :  { %v857_v26 = vpop.f32.mrb[11].mxu1 }
 0x1a6   :  { %v886_v27 = vmin.f32 %v857_v26, %v2142_v25 }
 0x1aa   :  { %v2121_v28 = vpop.f32.mrb[12].mxu0 }
 0x1ab   :  { %v660_v29 = vpop.f32.mrb[13].mxu0 }
 0x1ac   :  { %v677_v30 = vmin.f32 %v675_v18, %v660_v29  ;;  %v2122_v31 = vpop.f32.mrb[14].mxu0 }
 0x1ad   :  { %v663_v32 = vpop.f32.mrb[15].mxu0 }
 0x1ae   :  { %v679_v33 = vmin.f32 %v677_v30, %v2121_v28  ;;  %v678_v34 = vmin.f32 %v676_v21, %v663_v32 }
 0x1b0   :  { %v681_v35 = vadd.f32 %v679_v33, %v471_v13  ;;  %v680_v36 = vmin.f32 %v678_v34, %v2122_v31 }
 0x1b2   :  { %v682_v37 = vadd.f32 %v680_v36, %v472_v15  ;;  %v2145_v38 = vpop.f32.mrb[12].mxu1 }
 0x1b3   :  { %v870_v39 = vpop.f32.mrb[13].mxu1 }
 0x1b4   :  { %v887_v40 = vmin.f32 %v885_v24, %v870_v39  ;;  %v2146_v41 = vpop.f32.mrb[14].mxu1 }
 0x1b5   :  { %v873_v42 = vpop.f32.mrb[15].mxu1 }
 0x1b6   :  { %v889_v43 = vmin.f32 %v887_v40, %v2145_v38  ;;  %v888_v44 = vmin.f32 %v886_v27, %v873_v42 }
 0x1b8   :  { %v891_v45 = vadd.f32 %v889_v43, %v681_v35  ;;  %v890_v46 = vmin.f32 %v888_v44, %v2146_v41 }
 0x1ba   :  { %v892_v47 = vadd.f32 %v890_v46, %v682_v37 }
 0x1bc   :  { %v2165_v48 = vpop.f32.mrb[16].mxu0 }
 0x1bd   :  { %v1064_v49 = vpop.f32.mrb[17].mxu0 }
 0x1be   :  { %v1095_v50 = vmin.f32 %v1064_v49, %v2165_v48  ;;  %v2166_v51 = vpop.f32.mrb[18].mxu0 }
 0x1bf   :  { %v1067_v52 = vpop.f32.mrb[19].mxu0 }
 0x1c0   :  { %v1096_v53 = vmin.f32 %v1067_v52, %v2166_v51 }
 0x1c2   :  { %v2189_v54 = vpop.f32.mrb[16].mxu1 }
 0x1c3   :  { %v1274_v55 = vpop.f32.mrb[17].mxu1 }
 0x1c4   :  { %v1305_v56 = vmin.f32 %v1274_v55, %v2189_v54  ;;  %v2190_v57 = vpop.f32.mrb[18].mxu1 }
 0x1c5   :  { %v1277_v58 = vpop.f32.mrb[19].mxu1 }
 0x1c6   :  { %v1306_v59 = vmin.f32 %v1277_v58, %v2190_v57 }
 0x1ca   :  { %v2169_v60 = vpop.f32.mrb[20].mxu0 }
 0x1cb   :  { %v1080_v61 = vpop.f32.mrb[21].mxu0 }
 0x1cc   :  { %v1097_v62 = vmin.f32 %v1095_v50, %v1080_v61  ;;  %v2170_v63 = vpop.f32.mrb[22].mxu0 }
 0x1cd   :  { %v1083_v3 = vpop.f32.mrb[23].mxu0 }
 0x1ce   :  { %v1099_v4 = vmin.f32 %v1097_v62, %v2169_v60  ;;  %v1098_v1 = vmin.f32 %v1096_v53, %v1083_v3 }
 0x1d0   :  { %v1101_v5 = vadd.f32 %v1099_v4, %v891_v45  ;;  %v1100_v0 = vmin.f32 %v1098_v1, %v2170_v63  ;;  %v1954_v45 = vld [vmem:[%s2604_s2] ss:$0 sm:$0xff] }
 0x1d2   :  { %v1102_v2 = vadd.f32 %v1100_v0, %v892_v47  ;;  %v2193_v6 = vpop.f32.mrb[20].mxu1 }
 0x1d3   :  { %v1290_v7 = vpop.f32.mrb[21].mxu1 }
 0x1d4   :  { %v1307_v8 = vmin.f32 %v1305_v56, %v1290_v7  ;;  %v2194_v9 = vpop.f32.mrb[22].mxu1 }
 0x1d5   :  { %v1293_v10 = vpop.f32.mrb[23].mxu1 }
 0x1d6   :  { %v1309_v11 = vmin.f32 %v1307_v8, %v2193_v6  ;;  %v1308_v12 = vmin.f32 %v1306_v59, %v1293_v10 }
 0x1d8   :  { %v1311_v13 = vadd.f32 %v1309_v11, %v1101_v5  ;;  %v1310_v14 = vmin.f32 %v1308_v12, %v2194_v9 }
 0x1da   :  { %v1312_v15 = vadd.f32 %v1310_v14, %v1102_v2 }
 0x1dc   :  { %v2213_v16 = vpop.f32.mrb[24].mxu0 }
 0x1dd   :  { %v1484_v17 = vpop.f32.mrb[25].mxu0 }
 0x1de   :  { %v1515_v18 = vmin.f32 %v1484_v17, %v2213_v16  ;;  %v2214_v19 = vpop.f32.mrb[26].mxu0 }
 0x1df   :  { %v1487_v20 = vpop.f32.mrb[27].mxu0 }
 0x1e0   :  { %v1516_v21 = vmin.f32 %v1487_v20, %v2214_v19 }
 0x1e2   :  { %v2237_v22 = vpop.f32.mrb[24].mxu1 }
 0x1e3   :  { %v1694_v23 = vpop.f32.mrb[25].mxu1 }
 0x1e4   :  { %v1725_v24 = vmin.f32 %v1694_v23, %v2237_v22  ;;  %v2238_v25 = vpop.f32.mrb[26].mxu1 }
 0x1e5   :  { %v1697_v26 = vpop.f32.mrb[27].mxu1 }
 0x1e6   :  { %v1726_v27 = vmin.f32 %v1697_v26, %v2238_v25 }
 0x1ea   :  { %v2217_v28 = vpop.f32.mrb[28].mxu0 }
 0x1eb   :  { %v1500_v29 = vpop.f32.mrb[29].mxu0 }
 0x1ec   :  { %v1517_v30 = vmin.f32 %v1515_v18, %v1500_v29  ;;  %v2218_v31 = vpop.f32.mrb[30].mxu0 }
 0x1ed   :  { %v1503_v32 = vpop.f32.mrb[31].mxu0 }
 0x1ee   :  { %v1519_v33 = vmin.f32 %v1517_v30, %v2217_v28  ;;  %v1518_v34 = vmin.f32 %v1516_v21, %v1503_v32 }
 0x1f0   :  { %v1521_v35 = vadd.f32 %v1519_v33, %v1311_v13  ;;  %v1520_v36 = vmin.f32 %v1518_v34, %v2218_v31 }
 0x1f2   :  { %v1522_v37 = vadd.f32 %v1520_v36, %v1312_v15 }
 0x1f3   :  { %v2241_v38 = vpop.f32.mrb[28].mxu1 }
 0x1f4   :  { %v1710_v39 = vpop.f32.mrb[29].mxu1 }
 0x1f5   :  { %v1727_v40 = vmin.f32 %v1725_v24, %v1710_v39  ;;  %v2242_v41 = vpop.f32.mrb[30].mxu1 }
 0x1f6   :  { %v1713_v42 = vpop.f32.mrb[31].mxu1 }
 0x1f7   :  { %v1729_v43 = vmin.f32 %v1727_v40, %v2241_v38  ;;  %v1728_v44 = vmin.f32 %v1726_v27, %v1713_v42 }
 0x1f9   :  { %v1731_v46 = vadd.f32 %v1729_v43, %v1521_v35  ;;  %v1730_v47 = vmin.f32 %v1728_v44, %v2242_v41 }
 0x1fb   :  { %v1740_v48 = vadd.f32 %v1954_v45, %v1731_v46  ;;  %v1732_v49 = vadd.f32 %v1730_v47, %v1522_v37 }
 0x1fd   :  { %1742 = vst [vmem:[#allocation7] sm:$0xff] %v1740_v48  ;;  %v1741_v50 = vadd.f32 %v1954_v45, %v1732_v49 }
 0x1ff   :  { %1743 = vst [vmem:[#allocation7 + $0x8] sm:$0xff] %v1741_v50 }
 0x200   :  { %2370 = shalt.err (!%p2367_p6)
}
 0x201   :  { %s2371_s2 = scalar_lea.hbm %s2605_s3, 256 }
 0x202   :  { %p2372_p7 = scmp.ne.s32.totalorder %s2605_s3, %s2371_s2  ;;  %p2375_p8 = scmp.lt.u32.totalorder %s2371_s2, %s2605_s3 }
 0x204   :  { %p2377_p9 = pnand %p2375_p8, %p2372_p7 }
 0x206   :  { %2380 = shalt.err (!%p2377_p9)
}
 0x207   :  { %s2393_s20 = smov 128   ;;  %s2394_s21 = smov 8  }
 0x208   :  { %1755 = dma.vmem_to_hbm [thread:$0]  %s1750_s12, 256, %s2605_s3, [#allocation4], %s2393_s20, %s2393_s20, %s2394_s21  }
 0x209   :  { %2385 = dma.done.wait [#allocation4], 256  }
 0x20a   :  { %2386 = vsyncadd [#allocation4], 4294967040 }
 0x20b   :  { %1759 = vsyncpa [#allocation3], 1 }
 0x20c   :  { %1760 = vsyncpa [#allocation6], 1 }
 0x20d   :  { %1761 = vsyncpa [#allocation4], 1 }

</bundles_post_ra>
